<compile_context>
chip_gen: v6e
topology: v6e:2x2x1
jax: 0.10.0
libtpu: 0.0.40
codegen_flags: <defaults>
</compile_context>

<pallas_src>
import functools

import jax
import jax.numpy as jnp
from jax import lax
from jax.experimental import pallas as pl
from jax.experimental.pallas import tpu as pltpu


def _masked_offset_loss_kernel(pred_ref, target_ref, mask_ref,
                               loss_acc_ref, mask_acc_ref, *, inv_c):
    step = pl.program_id(1)

    @pl.when(step == 0)
    def _():
        loss_acc_ref[...] = jnp.zeros_like(loss_acc_ref)
        mask_acc_ref[...] = jnp.zeros_like(mask_acc_ref)

    p = pred_ref[...].astype(jnp.float32)     # (C, tn)
    t = target_ref[...].astype(jnp.float32)   # (C, tn)
    m = mask_ref[...].astype(jnp.float32)     # (1, tn)

    # weight = clip(1 / ||t||_2, 1e-6, 2); rsqrt(0) = inf -> clipped to 2.
    sumsq = jnp.sum(t * t, axis=0, keepdims=True)           # (1, tn)
    w = jnp.clip(lax.rsqrt(sumsq), 1e-6, 2.0)                # (1, tn)

    # mean_c(|p - t| * w) == sum_c(|p - t|) * (w / C)
    l1 = jnp.sum(jnp.abs(p - t), axis=0, keepdims=True)      # (1, tn)
    per_row = l1 * (w * inv_c) * m                           # (1, tn)

    loss_acc_ref[...] += per_row[None]                       # (1, 1, tn)
    mask_acc_ref[...] += m[None]


def masked_offset_loss(pred, target, mask, *, tn=65536, ncores=2):
    """pred, target: (B, N, C); mask: (B, N). Returns scalar f32 loss.

    Note: if mask.sum() == 0 the result is NaN/Inf, same as the PyTorch op.
    """
    B, N, C = pred.shape
    assert target.shape == (B, N, C) and mask.shape == (B, N)
    M = B * N

    # ---- lane-tile selection: big enough to amortize per-step overhead, ----
    # ---- small enough to sit well inside scoped VMEM even on v7x.       ----
    in_itemsize = max(jnp.dtype(pred.dtype).itemsize,
                      jnp.dtype(target.dtype).itemsize)
    mask_itemsize = jnp.dtype(mask.dtype).itemsize
    vmem_budget = 16 * 1024 * 1024                 # conservative (v7x: 32 MiB scope)
    bytes_per_lane = (2 * 2 * C * in_itemsize      # pred+target, double-buffered
                      + 2 * mask_itemsize          # mask, double-buffered
                      + 2 * 2 * 4)                 # two f32 accumulator blocks
    tn_cap = max(128, (vmem_budget // bytes_per_lane) // 128 * 128)
    tn_needed = ((pl.cdiv(M, ncores) + 127) // 128) * 128
    tn = max(128, min(tn, tn_cap, tn_needed))

    steps_per_core = pl.cdiv(M, ncores * tn)
    m_padded = ncores * steps_per_core * tn

    # ---- layout plumbing: M on lanes, C on sublanes; zero-pad M. ----
    # Padded rows: pred = target = 0 -> |p - t| = 0, and mask = 0, so they
    # contribute nothing to either accumulated sum.
    pred_t = pred.reshape(M, C).T        # (C, M), native dtype (no upcast)
    target_t = target.reshape(M, C).T    # (C, M)
    mask_r = mask.reshape(1, M)          # (1, M)
    pad = m_padded - M
    if pad:
        pred_t = jnp.pad(pred_t, ((0, 0), (0, pad)))
        target_t = jnp.pad(target_t, ((0, 0), (0, pad)))
        mask_r = jnp.pad(mask_r, ((0, 0), (0, pad)))

    kernel = functools.partial(_masked_offset_loss_kernel, inv_c=1.0 / C)

    def in_map(c, i):
        return (0, c * steps_per_core + i)

    def out_map(c, i):
        return (c, 0, 0)

    loss_part, mask_part = pl.pallas_call(
        kernel,
        out_shape=(jax.ShapeDtypeStruct((ncores, 1, tn), jnp.float32),
                   jax.ShapeDtypeStruct((ncores, 1, tn), jnp.float32)),
        grid_spec=pltpu.PrefetchScalarGridSpec(
            num_scalar_prefetch=0,
            grid=(ncores, steps_per_core),
            in_specs=[
                pl.BlockSpec((C, tn), in_map),
                pl.BlockSpec((C, tn), in_map),
                pl.BlockSpec((1, tn), in_map),
            ],
            out_specs=[
                pl.BlockSpec((1, 1, tn), out_map),
                pl.BlockSpec((1, 1, tn), out_map),
            ],
        ),
        compiler_params=pltpu.CompilerParams(
            dimension_semantics=("parallel", "arbitrary")),
    )(pred_t, target_t, mask_r)

    # Final reduce of lane-dense per-core partials + scalar divide in JAX glue.
    return (jnp.sum(loss_part) / jnp.sum(mask_part)).astype(jnp.float32)


def _reference(pred, target, mask):
    # Pure-JAX reference mirroring the PyTorch forward.
    norm = jnp.linalg.norm(target, axis=2, keepdims=True)
    weight = jnp.clip(1.0 / norm, 1e-6, 2.0)
    loss = jnp.abs(pred - target) * weight
    loss = jnp.mean(loss, axis=2)
    loss = loss * mask
    return loss.sum() / mask.sum()


if __name__ == "__main__":
    key = jax.random.PRNGKey(0)
    k1, k2, k3 = jax.random.split(key, 3)

    B, N, C = 2, 16, 2   # offsets: 2 channels per point
    pred = jax.random.normal(k1, (B, N, C), dtype=jnp.float32)
    target = jax.random.normal(k2, (B, N, C), dtype=jnp.float32)
    mask = (jax.random.uniform(k3, (B, N)) > 0.3).astype(jnp.float32)

    out = masked_offset_loss(pred, target, mask)
    out = jax.block_until_ready(out)

    ref = _reference(pred, target, mask)
    assert jnp.allclose(out, ref, rtol=1e-5, atol=1e-5), (out, ref)

    print("KERNEL_OK")
</pallas_src>

<mosaic_0001>
module attributes {stable_mosaic.version = 11 : i64} {
  func.func @_masked_offset_loss_kernel(%arg0: i32, %arg1: i32, %arg2: memref<2x128xf32, #tpu.memory_space<vmem>>, %arg3: memref<2x128xf32, #tpu.memory_space<vmem>>, %arg4: memref<1x128xf32, #tpu.memory_space<vmem>>, %arg5: memref<1x1x128xf32, #tpu.memory_space<vmem>>, %arg6: memref<1x1x128xf32, #tpu.memory_space<vmem>>) attributes {dimension_semantics = [#tpu.dimension_semantics<parallel>, #tpu.dimension_semantics<arbitrary>], iteration_bounds = array<i64: 2, 1>, scalar_prefetch = 0 : i64, scratch_operands = 0 : i64, tpu.core_type = #tpu.core_type<tc>, window_params = [{transform_indices = @transform_0, window_bounds = array<i64: 2, 128>}, {transform_indices = @transform_1, window_bounds = array<i64: 2, 128>}, {transform_indices = @transform_2, window_bounds = array<i64: 1, 128>}, {transform_indices = @transform_3, window_bounds = array<i64: 1, 1, 128>}, {transform_indices = @transform_4, window_bounds = array<i64: 1, 1, 128>}]} {
    %c0_i32 = arith.constant 0 : i32
    %0 = arith.cmpi eq, %arg1, %c0_i32 : i32
    %1 = arith.extui %0 : i1 to i32
    %c0_i32_0 = arith.constant 0 : i32
    %2 = arith.cmpi ne, %1, %c0_i32_0 : i32
    scf.if %2 {
      %cst_22 = arith.constant 0.000000e+00 : f32
      %30 = vector.broadcast %cst_22 : f32 to vector<1x1x128xf32>
      %c0_23 = arith.constant 0 : index
      %c0_24 = arith.constant 0 : index
      %c0_25 = arith.constant 0 : index
      %31 = vector.load %arg5[%c0_23, %c0_24, %c0_25] : memref<1x1x128xf32, #tpu.memory_space<vmem>>, vector<1x1x128xf32>
      tpu.vector_store %arg5[%c0_23, %c0_24, %c0_25], %30 {strides = array<i32>} : memref<1x1x128xf32, #tpu.memory_space<vmem>>, vector<1x1x128xf32>,
      %cst_26 = arith.constant 0.000000e+00 : f32
      %32 = vector.broadcast %cst_26 : f32 to vector<1x1x128xf32>
      %c0_27 = arith.constant 0 : index
      %c0_28 = arith.constant 0 : index
      %c0_29 = arith.constant 0 : index
      %33 = vector.load %arg6[%c0_27, %c0_28, %c0_29] : memref<1x1x128xf32, #tpu.memory_space<vmem>>, vector<1x1x128xf32>
      tpu.vector_store %arg6[%c0_27, %c0_28, %c0_29], %32 {strides = array<i32>} : memref<1x1x128xf32, #tpu.memory_space<vmem>>, vector<1x1x128xf32>,
    } else {
    }
    %c0 = arith.constant 0 : index
    %c0_1 = arith.constant 0 : index
    %3 = vector.load %arg2[%c0, %c0_1] : memref<2x128xf32, #tpu.memory_space<vmem>>, vector<2x128xf32>
    %c0_2 = arith.constant 0 : index
    %c0_3 = arith.constant 0 : index
    %4 = vector.load %arg3[%c0_2, %c0_3] : memref<2x128xf32, #tpu.memory_space<vmem>>, vector<2x128xf32>
    %c0_4 = arith.constant 0 : index
    %c0_5 = arith.constant 0 : index
    %5 = vector.load %arg4[%c0_4, %c0_5] : memref<1x128xf32, #tpu.memory_space<vmem>>, vector<1x128xf32>
    %6 = arith.mulf %4, %4 : vector<2x128xf32>
    %cst = arith.constant dense<0.000000e+00> : vector<128xf32>
    %7 = vector.multi_reduction <add>, %6, %cst [0] : vector<2x128xf32> to vector<128xf32>
    %8 = vector.shape_cast %7 : vector<128xf32> to vector<1x128xf32>
    %9 = math.rsqrt %8 : vector<1x128xf32>
    %cst_6 = arith.constant 9.99999997E-7 : f32
    %cst_7 = arith.constant 2.000000e+00 : f32
    %10 = vector.broadcast %cst_6 : f32 to vector<1x128xf32>
    %11 = arith.maximumf %10, %9 : vector<1x128xf32>
    %12 = vector.broadcast %cst_7 : f32 to vector<1x128xf32>
    %13 = arith.minimumf %12, %11 : vector<1x128xf32>
    %14 = arith.subf %3, %4 : vector<2x128xf32>
    %15 = math.absf %14 : vector<2x128xf32>
    %cst_8 = arith.constant dense<0.000000e+00> : vector<128xf32>
    %16 = vector.multi_reduction <add>, %15, %cst_8 [0] : vector<2x128xf32> to vector<128xf32>
    %17 = vector.shape_cast %16 : vector<128xf32> to vector<1x128xf32>
    %cst_9 = arith.constant 5.000000e-01 : f32
    %18 = vector.broadcast %cst_9 : f32 to vector<1x128xf32>
    %19 = arith.mulf %13, %18 : vector<1x128xf32>
    %20 = arith.mulf %17, %19 : vector<1x128xf32>
    %21 = arith.mulf %20, %5 : vector<1x128xf32>
    %c0_10 = arith.constant 0 : index
    %c0_11 = arith.constant 0 : index
    %c0_12 = arith.constant 0 : index
    %22 = vector.load %arg5[%c0_10, %c0_11, %c0_12] : memref<1x1x128xf32, #tpu.memory_space<vmem>>, vector<1x1x128xf32>
    %23 = vector.shape_cast %21 : vector<1x128xf32> to vector<1x1x128xf32>
    %24 = arith.addf %22, %23 : vector<1x1x128xf32>
    %c0_13 = arith.constant 0 : index
    %c0_14 = arith.constant 0 : index
    %c0_15 = arith.constant 0 : index
    %25 = vector.load %arg5[%c0_13, %c0_14, %c0_15] : memref<1x1x128xf32, #tpu.memory_space<vmem>>, vector<1x1x128xf32>
    tpu.vector_store %arg5[%c0_13, %c0_14, %c0_15], %24 {strides = array<i32>} : memref<1x1x128xf32, #tpu.memory_space<vmem>>, vector<1x1x128xf32>,
    %c0_16 = arith.constant 0 : index
    %c0_17 = arith.constant 0 : index
    %c0_18 = arith.constant 0 : index
    %26 = vector.load %arg6[%c0_16, %c0_17, %c0_18] : memref<1x1x128xf32, #tpu.memory_space<vmem>>, vector<1x1x128xf32>
    %27 = vector.shape_cast %5 : vector<1x128xf32> to vector<1x1x128xf32>
    %28 = arith.addf %26, %27 : vector<1x1x128xf32>
    %c0_19 = arith.constant 0 : index
    %c0_20 = arith.constant 0 : index
    %c0_21 = arith.constant 0 : index
    %29 = vector.load %arg6[%c0_19, %c0_20, %c0_21] : memref<1x1x128xf32, #tpu.memory_space<vmem>>, vector<1x1x128xf32>
    tpu.vector_store %arg6[%c0_19, %c0_20, %c0_21], %28 {strides = array<i32>} : memref<1x1x128xf32, #tpu.memory_space<vmem>>, vector<1x1x128xf32>,
    return
  }
  func.func @transform_0(%arg0: i32, %arg1: i32) -> (i32, i32) {
    %c1_i32 = arith.constant 1 : i32
    %0 = arith.muli %arg0, %c1_i32 : i32
    %1 = arith.addi %0, %arg1 : i32
    %c0_i32 = arith.constant 0 : i32
    %c0_i32_0 = arith.constant 0 : i32
    return %c0_i32, %1 : i32, i32
  }
  func.func @transform_1(%arg0: i32, %arg1: i32) -> (i32, i32) {
    %c1_i32 = arith.constant 1 : i32
    %0 = arith.muli %arg0, %c1_i32 : i32
    %1 = arith.addi %0, %arg1 : i32
    %c0_i32 = arith.constant 0 : i32
    %c0_i32_0 = arith.constant 0 : i32
    return %c0_i32, %1 : i32, i32
  }
  func.func @transform_2(%arg0: i32, %arg1: i32) -> (i32, i32) {
    %c1_i32 = arith.constant 1 : i32
    %0 = arith.muli %arg0, %c1_i32 : i32
    %1 = arith.addi %0, %arg1 : i32
    %c0_i32 = arith.constant 0 : i32
    %c0_i32_0 = arith.constant 0 : i32
    return %c0_i32, %1 : i32, i32
  }
  func.func @transform_3(%arg0: i32, %arg1: i32) -> (i32, i32, i32) {
    %c0_i32 = arith.constant 0 : i32
    %c0_i32_0 = arith.constant 0 : i32
    %c0_i32_1 = arith.constant 0 : i32
    return %arg0, %c0_i32, %c0_i32_0 : i32, i32, i32
  }
  func.func @transform_4(%arg0: i32, %arg1: i32) -> (i32, i32, i32) {
    %c0_i32 = arith.constant 0 : i32
    %c0_i32_0 = arith.constant 0 : i32
    %c0_i32_1 = arith.constant 0 : i32
    return %arg0, %c0_i32, %c0_i32_0 : i32, i32, i32
  }
}

</mosaic_0001>

<bundles_post_ra>
// kernel: tpu_custom_call.1
= control target key start
LH: loop header
LB: loop body
LE: loop exit
PB: predicated region body
PF: predicated region fallthrough
CT: control target
= control target key end

     0   :  { %10 = vsyncpa [#allocation3], 0  ;;  %s1005_s0 = inlined_call_operand.hbm [shape: f32[2,256], index: 0, kind: input, shape index: {}]   ;;  %s1006_s1 = inlined_call_operand.hbm [shape: f32[2,256], index: 1, kind: input, shape index: {}]   ;;  %s1007_s2 = inlined_call_operand.vmem [shape: f32[1,256], index: 2, kind: input, shape index: {}]   ;;  %s1008_s3 = inlined_call_operand.hbm [shape: f32[2,1,128], index: 3, kind: output, shape index: {0}]   ;;  %s1009_s4 = inlined_call_operand.hbm [shape: f32[2,1,128], index: 4, kind: output, shape index: {1}]  }
   0x1   :  { %12 = vsyncpa [#allocation3 + $0x1], 0 }
   0x2   :  { %13 = vsyncpa [#allocation6], 0 }
   0x3   :  { %15 = vsyncpa [#allocation6 + $0x1], 0 }
   0x4   :  { %16 = vsyncpa [#allocation4], 0 }
   0x5   :  { %18 = vsyncpa [#allocation4 + $0x1], 0 }
   0x6   :  { %19 = vsyncpa [#allocation9], 0 }
   0x7   :  { %21 = vsyncpa [#allocation9 + $0x1], 0  ;;  %s797_s15 = smov 0   ;;  %s799_s16 = smov 0  }
   0x8   :  { %s801_s17 = smov 0   ;;  %s803_s18 = smov 0  }
   0x9   :  { %s805_s19 = smov 0   ;;  %s807_s20 = smov 0  }
   0xa LB: > { %s505_s21 = sadd.s32 4294967295, %s765_s20   ;;  %s506_s22 = sadd.s32 4294967294, %s765_s20   ;;  %s765_s20 = sphi %s807_s20, %s27_s20   ;;  %s761_s19 = sphi %s805_s19, %s1021_s19   ;;  %s757_s18 = sphi %s803_s18, %s1020_s18   ;;  %s753_s17 = sphi %s801_s17, %s1019_s17   ;;  %s749_s16 = sphi %s799_s16, %s1018_s16   ;;  %s745_s15 = sphi %s797_s15, %s1017_s15  }
   0xb   : > { %s39_s23 = sadd.s32 1, %s761_s19  ;;  %s48_s24 = sadd.s32 1, %s753_s17 }
   0xc   : > { %p41_p0 = scmp.ge.s32.totalorder %s39_s23, 2  ;;  %p55_p1 = scmp.ne.s32.totalorder %s753_s17, %s749_s16 }
   0xd   : > { %p56_p2 = scmp.eq.s32.totalorder %s765_s20, 0  ;;  %p61_p3 = scmp.ne.s32.totalorder %s749_s16, %s745_s15 }
   0xe   : > { %s1023_s23 = smov (%p41_p0, %s39_s23), 0  ;;  %p62_p5 = scmp.eq.s32.totalorder %s505_s21, 0 }
   0xf   : > { %p838_p4 = por %p56_p2, %p55_p1  ;;  %s45_s26 = ssub.s32 %s761_s19, %s1023_s23 }
  0x10   : > { %p141_p6 = scmp.eq.s32.totalorder %s505_s21, 1  ;;  %p46_p7 = scmp.eq.s32.totalorder %s45_s26, 0 }
  0x11   : > { %p844_p8 = por %p62_p5, %p61_p3  ;;  %p147_p10 = scmp.eq.s32.totalorder %s506_s22, 1 }
  0x12   : > { %p848_p9 = por %p141_p6, %p55_p1  ;;  %p542_p13 = scmp.lt.s32.totalorder %s765_s20, 2 }
  0x13   : > { %s853_s29 = scalar_select %p46_p7, %s753_s17, %s48_s24  }
  0x14   : > { %p855_p11 = por %p147_p10, %p61_p3  ;;  %s862_s5 = sand.u32 1, %s753_s17  }
  0x15   : > { %s509_s6 = sshll.u32 %s862_s5, 1  ;;  %s510_s7 = sshll.u32 %s761_s19, 5 }
  0x16   : > { %s203_s10 = scalar_lea.hbm %s1005_s0, %s510_s7  ;;  %s197_s11 = scalar_lea.vmem [#allocation2], %s509_s6 }
  0x17   : > { %s205_s12 = sshll.u32 %s197_s11, 4  ;;  %p871_p0 = pnand %p542_p13, %p838_p4  ;;  %s206_s12 = int_to_ptr.vmem [resolvable:$true] %s205_s12 }
  0x18   : > { %p513_p1 = scmp.ge.s32.totalorder %s765_s20, 1  ;;  %p237_p2 = scmp.lt.s32.totalorder %s765_s20, 3 }
  0x19   : > { %s194_s14 = scalar_lea.sflag [#allocation3], %s862_s5  ;;  %p597_p3 = pneg %p871_p0 }
  0x1a   : > { %s608_s21 = scalar_lea.vmem %s206_s12, 32  ;;  %s767_s22 = smov [#allocation2]  }
  0x1b   : > { %p609_p5 = scmp.ne.s32.totalorder %s206_s12, %s608_s21  ;;  %s613_s24 = sshll.u32 %s767_s22, 4  ;;  %s614_s24 = int_to_ptr.vmem [resolvable:$false] %s613_s24 }
  0x1c   : > { %s615_s25 = scalar_lea.vmem %s614_s24, 64  ;;  %p616_p4 = scmp.lt.s32.totalorder %s206_s12, %s614_s24 }
  0x1d   : > { %p611_p6 = pnand %p609_p5, %p597_p3  ;;  %p617_p10 = scmp.lt.s32.totalorder %s615_s25, %s608_s21 }
  0x1f   : > { %p612_p7 = pneg %p611_p6  ;;  %p618_p13 = por %p617_p10, %p616_p4 }
  0x21   : > { %p619_p12 = pnand %p618_p13, %p612_p7 }
  0x23   : > { %622 = shalt.err (!%p619_p12)
}
  0x24   : > { %531 = dma.hbm_to_vmem [thread:$0]  (!%p871_p0), %s203_s10, 32, %s206_s12, %s194_s14  }
  0x25   : > { %p889_p5 = pnand %p513_p1, %p237_p2  ;;  %s222_s11 = scalar_lea.hbm %s1006_s1, %s510_s7 }
  0x26   : > { %s216_s21 = scalar_lea.vmem [#allocation5], %s509_s6  ;;  %s213_s24 = scalar_lea.sflag [#allocation6], %s862_s5 }
  0x27   : > { %s224_s22 = sshll.u32 %s216_s21, 4  ;;  %s768_s10 = smov [#allocation5]   ;;  %s225_s22 = int_to_ptr.vmem [resolvable:$true] %s224_s22 }
  0x28   : > { %s636_s25 = scalar_lea.vmem %s225_s22, 32  ;;  %s641_s12 = sshll.u32 %s768_s10, 4  ;;  %s642_s12 = int_to_ptr.vmem [resolvable:$false] %s641_s12 }
  0x29   : > { %p637_p12 = scmp.ne.s32.totalorder %s225_s22, %s636_s25  ;;  %s643_s14 = scalar_lea.vmem %s642_s12, 64 }
  0x2a   : > { %p644_p1 = scmp.lt.s32.totalorder %s225_s22, %s642_s12  ;;  %p645_p2 = scmp.lt.s32.totalorder %s643_s14, %s636_s25 }
  0x2b   : > { %p639_p6 = pnand %p637_p12, %p597_p3 }
  0x2c   : > { %p646_p4 = por %p645_p2, %p644_p1 }
  0x2d   : > { %p640_p7 = pneg %p639_p6 }
  0x2f   : > { %p647_p10 = pnand %p646_p4, %p640_p7 }
  0x31   : > { %650 = shalt.err (!%p647_p10)
}
  0x32   : > { %534 = dma.hbm_to_vmem [thread:$0]  (!%p871_p0), %s222_s11, 32, %s225_s22, %s213_s24  }
  0x33   : > { %241 = sbr.rel (%p889_p5) target bundleno = 134 (0x86), region = 32  ;;  %s905_s5 = sand.u32 (!%p889_p5), 1, %s749_s16  }
  0x34   : > { %s514_s6 = sshll.u32 (!%p889_p5), %s905_s5, 1  ;;  %s244_s7 = scalar_lea.sflag (!%p889_p5), [#allocation3], %s905_s5 }
  0x35   : > { %s247_s8 = scalar_lea.vmem (!%p889_p5), [#allocation2], %s514_s6 }
  0x38   : > { %728 = dma.done.wait (%p844_p8), %s244_s7, 32  }
  0x39   : > { %730 = vsyncadd (%p844_p8), %s244_s7, 4294967264  ;;  %s253_s13 = scalar_lea.sflag [#allocation6], %s905_s5  ;;  %s256_s9 = scalar_lea.vmem [#allocation5], %s514_s6 }
  0x3a   : > { %732 = dma.done.wait (%p844_p8), %s253_s13, 32  }
  0x3b   : > { %734 = vsyncadd (%p844_p8), %s253_s13, 4294967264  ;;  %s919_s26 = scalar_lea.vmem [#allocation7], %s905_s5  ;;  %v769_v0 = vmov 0.0   ;;  %s292_s11 = scalar_lea.vmem [#allocation8], %s905_s5  ;;  %v306_v1 = vld [vmem:[%s247_s8] sm:$0x3] }
  0x3c   : > { %304 = vst [vmem:[%s919_s26] sm:$0x1] %v769_v0  ;;  %305 = vst [vmem:[%s292_s11] sm:$0x1] %v769_v0  ;;  %p296_p0 = scmp.lt.s32.totalorder %s757_s18, 1  ;;  %s516_s25 = sshll.u32 %s757_s18, 4  ;;  %v307_v2 = vld [vmem:[%s256_s9] sm:$0x3] }
  0x3d   : > { %s369_s10 = sshll.u32 %s292_s11, 4  ;;  %vm310_vm0 = vcmask 1041408   ;;  %v309_v4 = vmul.f32 %v307_v2, %v307_v2  ;;  %v321_v5 = vsub.f32 %v306_v1, %v307_v2  ;;  %s934_s6 = scalar_lea.hbm %s1009_s4, %s516_s25  ;;  %s936_s10 = int_to_ptr.vmem [resolvable:$true] %s369_s10 }
  0x3e   : > { %s297_s21 = scalar_select %p296_p0, %s757_s18, 1 }
  0x3f   : > { %v311_v8 = vsel %vm310_vm0, %v309_v4, 0.0  ;;  %v322_v10 = vand.u32 2147483647, %v321_v5  ;;  %s344_s7 = scalar_lea.sflag [#allocation9], %s905_s5  ;;  %s651_s8 = scalar_lea.vmem %s936_s10, 16 }
  0x40   : > { %s298_s27 = scalar_lea.vmem %s1007_s2, %s297_s21  ;;  %v312_v9 = vrot.slane %v311_v8, 4  ;;  %p652_p8 = scmp.ne.s32.totalorder %s936_s10, %s651_s8 }
  0x41   : > { %v308_v3 = vld [vmem:[%s298_s27] sm:$0x1]  ;;  %s770_s13 = smov [#allocation8]  }
  0x42   : > { %p653_p3 = pnand %p652_p8, %p848_p9  ;;  %s655_s9 = sshll.u32 %s770_s13, 4  ;;  %s656_s9 = int_to_ptr.vmem [resolvable:$false] %s655_s9 }
  0x43   : > { %v336_v6 = vld [vmem:[%s292_s11] sm:$0x1]  ;;  %s657_s21 = scalar_lea.vmem %s656_s9, 32  ;;  %p658_p5 = scmp.lt.s32.totalorder %s936_s10, %s656_s9 }
  0x44   : > { %v337_v7 = vadd.f32 %v336_v6, %v308_v3  ;;  %p654_p13 = pneg %p653_p3  ;;  %p659_p12 = scmp.lt.s32.totalorder %s657_s21, %s651_s8 }
  0x46   : > { %338 = vst [vmem:[%s292_s11] sm:$0x1] %v337_v7  ;;  %p660_p6 = por %p659_p12, %p658_p5 }
  0x48   : > { %p661_p7 = pnand %p660_p6, %p654_p13 }
  0x4a   : > { %664 = shalt.err (!%p661_p7)
}
  0x4b   : > { %s665_s11 = scalar_lea.hbm %s934_s6, 16  ;;  %s669_s27 = scalar_lea.hbm %s1009_s4, 32 }
  0x4c   : > { %p666_p1 = scmp.ne.s32.totalorder %s934_s6, %s665_s11  ;;  %p670_p10 = scmp.lt.s32.totalorder %s934_s6, %s1009_s4 }
  0x4d   : > { %p671_p0 = scmp.lt.s32.totalorder %s669_s27, %s665_s11 }
  0x4e   : > { %p667_p2 = pnand %p666_p1, %p848_p9 }
  0x4f   : > { %p672_p8 = por %p671_p0, %p670_p10 }
  0x50   : > { %p668_p4 = pneg %p667_p2 }
  0x52   : > { %p673_p3 = pnand %p672_p8, %p668_p4 }
  0x54   : > { %676 = shalt.err (!%p673_p3)
}
  0x55   : > { %525 = dma.vmem_to_hbm [thread:$0]  (%p848_p9), %s936_s10, 16, %s934_s6, %s344_s7   ;;  %v313_v11 = vadd.f32 %v312_v9, %v311_v8  ;;  %v323_v13 = vsel %vm310_vm0, %v322_v10, 0.0  ;;  %v333_v28 = vld [vmem:[%s919_s26] sm:$0x1] }
  0x56   : > { %v324_v16 = vrot.slane %v323_v13, 4  ;;  %s356_s10 = sshll.u32 %s919_s26, 4  ;;  %s354_s8 = scalar_lea.hbm %s1008_s3, %s516_s25  ;;  %s357_s10 = int_to_ptr.vmem [resolvable:$true] %s356_s10 }
  0x57   : > { %v314_v12 = vrot.slane %v313_v11, 2  ;;  %s340_s13 = scalar_lea.sflag [#allocation4], %s905_s5  ;;  %s677_s9 = scalar_lea.vmem %s357_s10, 16 }
  0x58   : > { %v325_v18 = vadd.f32 %v324_v16, %v323_v13  ;;  %p678_p13 = scmp.ne.s32.totalorder %s357_s10, %s677_s9  ;;  %s771_s21 = smov [#allocation7]  }
  0x59   : > { %v315_v14 = vadd.f32 %v314_v12, %v313_v11  ;;  %s681_s11 = sshll.u32 %s771_s21, 4  ;;  %s682_s11 = int_to_ptr.vmem [resolvable:$false] %s681_s11 }
  0x5a   : > { %v326_v19 = vrot.slane %v325_v18, 2  ;;  %p679_p5 = pnand %p678_p13, %p848_p9  ;;  %s683_s22 = scalar_lea.vmem %s682_s11, 32 }
  0x5b   : > { %v316_v15 = vrot.slane %v315_v14, 1  ;;  %p684_p6 = scmp.lt.s32.totalorder %s357_s10, %s682_s11  ;;  %p685_p7 = scmp.lt.s32.totalorder %s683_s22, %s677_s9 }
  0x5c   : > { %v327_v20 = vadd.f32 %v326_v19, %v325_v18  ;;  %p680_p12 = pneg %p679_p5 }
  0x5d   : > { %v317_v17 = vadd.f32 %v316_v15, %v315_v14  ;;  %p686_p1 = por %p685_p7, %p684_p6 }
  0x5e   : > { %v328_v21 = vrot.slane %v327_v20, 1 }
  0x5f   : > { %593 = vrsqrt.f32 %v317_v17  ;;  %p687_p2 = pnand %p686_p1, %p680_p12 }
  0x60   : > { %v329_v25 = vadd.f32 %v328_v21, %v327_v20 }
  0x6c   : > { %v594_v22 = vpop.eup %593 }
  0x6d   : > { %v319_v23 = vmax.f32 %v594_v22, 1e-06 }
  0x6f   : > { %v320_v24 = vmin.f32 %v319_v23, 2.0 }
  0x71   : > { %v330_v26 = vmul.f32 0.5, %v320_v24 }
  0x73   : > { %v331_v27 = vmul.f32 %v330_v26, %v329_v25 }
  0x75   : > { %v332_v29 = vmul.f32 %v331_v27, %v308_v3 }
  0x77   : > { %v334_v30 = vadd.f32 %v333_v28, %v332_v29 }
  0x79   : > { %335 = vst [vmem:[%s919_s26] sm:$0x1] %v334_v30 }
  0x7a   : > { %690 = shalt.err (!%p687_p2)
}
  0x7b   : > { %s691_s18 = scalar_lea.hbm %s354_s8, 16  ;;  %s695_s25 = scalar_lea.hbm %s1008_s3, 32 }
  0x7c   : > { %p692_p4 = scmp.ne.s32.totalorder %s354_s8, %s691_s18  ;;  %p696_p8 = scmp.lt.s32.totalorder %s354_s8, %s1008_s3 }
  0x7d   : > { %p697_p3 = scmp.lt.s32.totalorder %s695_s25, %s691_s18 }
  0x7e   : > { %p693_p10 = pnand %p692_p4, %p848_p9 }
  0x7f   : > { %p698_p13 = por %p697_p3, %p696_p8 }
  0x80   : > { %p694_p0 = pneg %p693_p10 }
  0x82   : > { %p699_p5 = pnand %p698_p13, %p694_p0 }
  0x84   : > { %702 = shalt.err (!%p699_p5)
}
  0x85   : > { %524 = dma.vmem_to_hbm [thread:$0]  (%p848_p9), %s357_s10, 16, %s354_s8, %s340_s13  }
  0x86 PF: > { %s381_s12 = sand.u32 1, %s745_s15   ;;  %p1016_p12 = scmp.ge.s32.totalorder %s765_s20, 2 }
  0x87   : > { %s382_s14 = scalar_lea.sflag [#allocation4], %s381_s12 }
  0x88   : > { %p536_p6 = pnand %p1016_p12, %p855_p11 }
  0x8a   : > { %p537_p7 = pneg %p536_p6 }
  0x8c   : > { %736 = dma.done.wait (%p537_p7), %s382_s14, 16  }
  0x8d   : > { %738 = vsyncadd (%p537_p7), %s382_s14, 4294967280  ;;  %s390_s6 = scalar_lea.sflag [#allocation9], %s381_s12 }
  0x8e   : > { %740 = dma.done.wait (%p537_p7), %s390_s6, 16  }
  0x8f   : > { %742 = vsyncadd (%p537_p7), %s390_s6, 4294967280  ;;  %s27_s20 = sadd.s32 1, %s765_s20   ;;  %s1017_s15 = smov %s749_s16 }
  0x90   : > { %p24_p1 = scmp.ge.s32.totalorder %s27_s20, 4   ;;  %s1018_s16 = smov %s753_s17 }
  0x91   : > { %s1019_s17 = smov %s853_s29  ;;  %s1020_s18 = smov %s761_s19 }
  0x92   : > { %s1021_s19 = smov %s1023_s23  ;;  %26 = sbr.rel (!%p24_p1) target bundleno = 10 (0xa), region = 114 }
  0x97   :  { %394 = vsyncpa [#allocation3], 1 }
  0x98   :  { %396 = vsyncpa [#allocation3 + $0x1], 1 }
  0x99   :  { %397 = vsyncpa [#allocation6], 1 }
  0x9a   :  { %399 = vsyncpa [#allocation6 + $0x1], 1 }
  0x9b   :  { %400 = vsyncpa [#allocation4], 1 }
  0x9c   :  { %402 = vsyncpa [#allocation4 + $0x1], 1 }
  0x9d   :  { %403 = vsyncpa [#allocation9], 1 }
  0x9e   :  { %405 = vsyncpa [#allocation9 + $0x1], 1 }

</bundles_post_ra>
